<compile_context>
chip_gen: v6e
topology: v6e:2x2x1
jax: 0.10.0
libtpu: 0.0.40
codegen_flags: <defaults>
</compile_context>

<pallas_src>
import functools

import jax
import jax.numpy as jnp
from jax.experimental import pallas as pl
from jax.experimental.pallas import tpu as pltpu


def _round_up(x, m):
    return (x + m - 1) // m * m


# ----------------------------------------------------------------------------
# Device / generation info (v5e / v6e / v7x aware)
# ----------------------------------------------------------------------------
def _device_info():
    kind = ""
    try:
        kind = jax.devices()[0].device_kind.lower()
    except Exception:
        pass
    is_v7 = "v7" in kind
    is_v6 = "v6" in kind
    num_tc = 2 if is_v7 else 1            # v7x: 2 TensorCores / chip
    bf16_fast = is_v6 or is_v7            # bf16 VPU/EUP path (not on v5e)
    try:
        vmem_bytes = int(pltpu.get_tpu_info().vmem_capacity_bytes)
    except Exception:
        vmem_bytes = (64 << 20) if is_v7 else (128 << 20)
    return {"kind": kind, "num_tc": num_tc, "bf16_fast": bf16_fast,
            "vmem_bytes": vmem_bytes}


# ----------------------------------------------------------------------------
# Fused Pallas kernel: h = x; for each layer l: h = act_l(h @ W_l + b_l)
# ----------------------------------------------------------------------------
def _mlp_fused_kernel(*refs, acts, matmul_dtype, act_dtype):
    # refs = (x_ref, w0_ref, b0_ref, w1_ref, b1_ref, ..., o_ref)
    x_ref = refs[0]
    o_ref = refs[-1]
    wb_refs = refs[1:-1]

    num_layers = len(acts)
    h = x_ref[...]                                   # compute_dtype
    for l, act in enumerate(acts):
        w = wb_refs[2 * l][...]                      # (K_l, N_l), matmul_dtype
        b = wb_refs[2 * l + 1][...]                  # (1, N_l), f32
        # MXU matmul with f32 accumulation.
        y = jnp.dot(h.astype(matmul_dtype), w,
                    preferred_element_type=jnp.float32)
        y = y + b                                    # bias add in f32 (VPU)
        last = l == num_layers - 1
        if act == "relu":
            h = jnp.maximum(y, 0.0)
        else:
            # Padded lanes: sigmoid(0)=0.5 is harmless ONLY because the next
            # layer's padded weight rows are zero (see header comment).
            z = y if last else y.astype(act_dtype)   # bf16 EUP on v6e/v7x
            h = jax.nn.sigmoid(z) if act == "sigmoid" else jnp.tanh(z)
    o_ref[...] = h.astype(o_ref.dtype)


# ----------------------------------------------------------------------------
# One fused pallas_call over a list of layers (weights VMEM-resident)
# ----------------------------------------------------------------------------
def _fused_mlp_call(x, layer_params, layer_acts, *, compute_dtype, act_dtype,
                    info):
    num_layers = len(layer_params)
    B, K0 = x.shape
    dims = [K0] + [w.shape[1] for (w, _) in layer_params]
    dims_p = [_round_up(d, 128) for d in dims]       # lane-dense feature dims
    max_dim_p = max(dims_p)

    x_itemsize = jnp.dtype(compute_dtype).itemsize
    w_itemsize = jnp.dtype(compute_dtype).itemsize
    out_itemsize = 4                                  # f32 output
    granule = 16 if x_itemsize < 4 else 8             # bf16 packs 2 rows/sublane

    # --- tight VMEM accounting ------------------------------------------------
    # Weights/biases single-buffered (Buffered(1)); x/out double-buffered;
    # plus scratch for the intermediate activation chain.
    fixed_bytes = sum(dims_p[l] * dims_p[l + 1] * w_itemsize + dims_p[l + 1] * 4
                      for l in range(num_layers))
    per_row_bytes = (2 * dims_p[0] * x_itemsize
                     + 2 * dims_p[-1] * out_itemsize
                     + 3 * max_dim_p * 4)

    cap = int(info["vmem_bytes"] * 0.85)              # ~54 MiB v7x, ~108 MiB v5e/v6e
    sizing_budget = cap - (4 << 20)

    # --- auto-size the batch tile ----------------------------------------------
    tm = ((sizing_budget - fixed_bytes) // per_row_bytes) // granule * granule
    tm = max(tm, granule)
    tm = min(tm, 1024, _round_up(B, granule))
    # v7x megacore: keep >= num_tc grid steps when the batch allows it.
    if info["num_tc"] > 1 and B > granule:
        tm = min(tm, _round_up(pl.cdiv(B, info["num_tc"]), granule))
    tm = max(tm, granule)

    B_p = _round_up(B, tm)
    grid = (B_p // tm,)

    # --- pad operands (zero padding is exact for the matmul chain) -------------
    x_p = jnp.zeros((B_p, dims_p[0]), compute_dtype)
    x_p = x_p.at[:B, :K0].set(x.astype(compute_dtype))

    wb_inputs = []
    for l, (w, b) in enumerate(layer_params):
        Kp, Np = dims_p[l], dims_p[l + 1]
        w_p = jnp.zeros((Kp, Np), compute_dtype)
        w_p = w_p.at[: w.shape[0], : w.shape[1]].set(w.astype(compute_dtype))
        b_p = jnp.zeros((1, Np), jnp.float32).at[:, : b.shape[0]].set(b)
        wb_inputs += [w_p, b_p]

    # --- block specs ------------------------------------------------------------
    resident = pl.Buffered(1)   # constant index_map -> no need to double-buffer
    in_specs = [pl.BlockSpec((tm, dims_p[0]), lambda i: (i, 0))]
    for l in range(num_layers):
        in_specs.append(pl.BlockSpec((dims_p[l], dims_p[l + 1]),
                                     lambda i: (0, 0), pipeline_mode=resident))
        in_specs.append(pl.BlockSpec((1, dims_p[l + 1]),
                                     lambda i: (0, 0), pipeline_mode=resident))
    out_specs = pl.BlockSpec((tm, dims_p[-1]), lambda i: (i, 0))

    vmem_need = fixed_bytes + tm * per_row_bytes
    vmem_limit = int(min(cap, max(vmem_need + (8 << 20), 16 << 20)))

    # --- cost estimate from REAL (unpadded) dims ---------------------------------
    flops = 2 * B * sum(dims[l] * dims[l + 1] for l in range(num_layers))
    transcendentals = sum(B * dims[l + 1] for l in range(num_layers)
                          if layer_acts[l] in ("sigmoid", "tanh"))
    bytes_accessed = (int(x_p.size) * x_itemsize
                      + B_p * dims_p[-1] * out_itemsize
                      + sum(int(a.size) * a.dtype.itemsize for a in wb_inputs))
    cost = pl.CostEstimate(flops=int(flops), transcendentals=int(transcendentals),
                           bytes_accessed=int(bytes_accessed))

    kernel = functools.partial(_mlp_fused_kernel, acts=tuple(layer_acts),
                               matmul_dtype=compute_dtype, act_dtype=act_dtype)

    out_p = pl.pallas_call(
        kernel,
        out_shape=jax.ShapeDtypeStruct((B_p, dims_p[-1]), jnp.float32),
        grid=grid,
        in_specs=in_specs,
        out_specs=out_specs,
        compiler_params=pltpu.CompilerParams(
            dimension_semantics=("parallel",),
            vmem_limit_bytes=vmem_limit,
        ),
        cost_estimate=cost,
    )(x_p, *wb_inputs)

    return out_p[:B, : dims[-1]]


# ----------------------------------------------------------------------------
# Public entry: full MLP forward (fused, with a layer-streaming fallback)
# ----------------------------------------------------------------------------
def mlp_forward_fused(params, x, activation_type, *, compute_dtype=None):
    """params: list of (W, b) with W: (in, out) f32, b: (out,) f32.
    x: (B, in_features) f32.  compute_dtype: dtype fed to the MXU (default
    bf16 -- bf16-native MXUs on v5e/v6e/v7x); accumulation/bias stay f32."""
    act = {"Sigmoid": "sigmoid", "Tanh": "tanh", "ReLU": "relu"}[activation_type]
    num_layers = len(params)
    acts = [act] * (num_layers - 1) + ["relu"]       # module always ends in ReLU

    info = _device_info()
    if compute_dtype is None:
        compute_dtype = jnp.bfloat16                 # bf16 MXU inputs by default
    bf16_compute = jnp.dtype(compute_dtype) == jnp.dtype(jnp.bfloat16)
    # bf16 tanh/sigmoid epilogue only where the VPU/EUP has a bf16 path.
    act_dtype = jnp.bfloat16 if (info["bf16_fast"] and bf16_compute) else jnp.float32

    # Residency check: do all padded weights fit in VMEM alongside activations?
    w_itemsize = jnp.dtype(compute_dtype).itemsize
    dims = [x.shape[1]] + [w.shape[1] for (w, _) in params]
    dims_p = [_round_up(d, 128) for d in dims]
    fixed_bytes = sum(dims_p[l] * dims_p[l + 1] * w_itemsize + dims_p[l + 1] * 4
                      for l in range(num_layers))
    weight_budget = int(info["vmem_bytes"] * 0.85) - (8 << 20)

    if fixed_bytes <= weight_budget or num_layers == 1:
        # TODO(synk): add K-axis weight streaming for a single layer whose
        # padded weights exceed the VMEM residency budget.
        return _fused_mlp_call(x, params, acts, compute_dtype=compute_dtype,
                               act_dtype=act_dtype, info=info)

    # Streaming fallback: weights don't all fit -> run layer by layer, keeping
    # only one layer's weights resident per call (activations round-trip HBM).
    h = x
    for l in range(num_layers):
        h = _fused_mlp_call(h, [params[l]], [acts[l]],
                            compute_dtype=compute_dtype,
                            act_dtype=act_dtype, info=info)
    return h


# ----------------------------------------------------------------------------
# Parameter construction (deterministic, mimics nn.Linear's U(-1/sqrt(fan_in)))
# ----------------------------------------------------------------------------
def init_mlp_params(key, total_dims, hidden_dims, num_layers, input_steps,
                    output_steps):
    in_f = total_dims * input_steps
    hid_f = hidden_dims * input_steps

    layer_dims = [(in_f, hid_f)]
    for _ in range(max(num_layers - 2, 0)):
        layer_dims.append((hid_f, hid_f))
    layer_dims.append((hid_f, output_steps))

    params = []
    for (fan_in, fan_out) in layer_dims:
        key, kw, kb = jax.random.split(key, 3)
        bound = 1.0 / jnp.sqrt(jnp.float32(fan_in))
        # weight stored as (in, out)  (PyTorch stores (out, in); we transpose)
        w = jax.random.uniform(kw, (fan_in, fan_out), jnp.float32,
                               minval=-bound, maxval=bound)
        b = jax.random.uniform(kb, (fan_out,), jnp.float32,
                               minval=-bound, maxval=bound)
        params.append((w, b))
    return params


# ----------------------------------------------------------------------------
# Pure-JAX reference for sanity checking
# ----------------------------------------------------------------------------
def mlp_reference(params, x, activation_type):
    act_fn = {"Sigmoid": jax.nn.sigmoid, "Tanh": jnp.tanh,
              "ReLU": lambda v: jnp.maximum(v, 0.0)}[activation_type]
    h = x
    for (w, b) in params[:-1]:
        h = act_fn(h @ w + b)
    w, b = params[-1]
    return jnp.maximum(h @ w + b, 0.0)


if __name__ == "__main__":
    # Small, shape-consistent config (matches the PyTorch module):
    total_dims = 4
    hidden_dims = 4
    num_layers = 3      # Linear(32,32)+act, Linear(32,32)+act, Linear(32,8)+ReLU
    batch_size = 2
    input_steps = 8
    output_steps = 8
    activation_type = "Tanh"

    key = jax.random.PRNGKey(0)
    key, kx = jax.random.split(key)

    in_features = total_dims * input_steps          # 32
    x = jax.random.normal(kx, (batch_size, in_features), jnp.float32)

    params = init_mlp_params(key, total_dims, hidden_dims, num_layers,
                             input_steps, output_steps)

    ref = mlp_reference(params, x, activation_type)

    # f32 MXU path: exact padding invariants -> tight tolerance vs. reference.
    out_f32 = jax.block_until_ready(
        mlp_forward_fused(params, x, activation_type,
                          compute_dtype=jnp.float32))
    assert out_f32.shape == (batch_size, output_steps)
    assert jnp.allclose(out_f32, ref, atol=1e-5, rtol=1e-5), "f32 mismatch"

    # Default path: bf16 MXU inputs / HBM activations (bf16 epilogue on
    # v6e/v7x, f32 epilogue on v5e): loose tolerance.
    out_def = jax.block_until_ready(
        mlp_forward_fused(params, x, activation_type))
    assert out_def.shape == (batch_size, output_steps)
    assert bool(jnp.all(jnp.isfinite(out_def)))
    assert jnp.allclose(out_def, ref, atol=1e-1, rtol=1e-1), "bf16 mismatch"

    print("KERNEL_OK")
</pallas_src>

<mosaic_0001>
module attributes {stable_mosaic.version = 11 : i64} {
  func.func @_mlp_fused_kernel(%arg0: i32, %arg1: memref<8x128xf32, #tpu.memory_space<vmem>>, %arg2: memref<128x128xf32, #tpu.memory_space<vmem>>, %arg3: memref<1x128xf32, #tpu.memory_space<vmem>>, %arg4: memref<128x128xf32, #tpu.memory_space<vmem>>, %arg5: memref<1x128xf32, #tpu.memory_space<vmem>>, %arg6: memref<128x128xf32, #tpu.memory_space<vmem>>, %arg7: memref<1x128xf32, #tpu.memory_space<vmem>>, %arg8: memref<8x128xf32, #tpu.memory_space<vmem>>) attributes {dimension_semantics = [#tpu.dimension_semantics<parallel>], iteration_bounds = array<i64: 1>, scalar_prefetch = 0 : i64, scratch_operands = 0 : i64, tpu.core_type = #tpu.core_type<tc>, window_params = [{transform_indices = @transform_0, window_bounds = array<i64: 8, 128>}, {pipeline_mode = #tpu.pipeline_mode<synchronous>, transform_indices = @transform_1, window_bounds = array<i64: 128, 128>}, {pipeline_mode = #tpu.pipeline_mode<synchronous>, transform_indices = @transform_2, window_bounds = array<i64: 1, 128>}, {pipeline_mode = #tpu.pipeline_mode<synchronous>, transform_indices = @transform_3, window_bounds = array<i64: 128, 128>}, {pipeline_mode = #tpu.pipeline_mode<synchronous>, transform_indices = @transform_4, window_bounds = array<i64: 1, 128>}, {pipeline_mode = #tpu.pipeline_mode<synchronous>, transform_indices = @transform_5, window_bounds = array<i64: 128, 128>}, {pipeline_mode = #tpu.pipeline_mode<synchronous>, transform_indices = @transform_6, window_bounds = array<i64: 1, 128>}, {transform_indices = @transform_7, window_bounds = array<i64: 8, 128>}]} {
    %c0 = arith.constant 0 : index
    %c0_0 = arith.constant 0 : index
    %0 = vector.load %arg1[%c0, %c0_0] : memref<8x128xf32, #tpu.memory_space<vmem>>, vector<8x128xf32>
    %c0_1 = arith.constant 0 : index
    %c0_2 = arith.constant 0 : index
    %1 = vector.load %arg2[%c0_1, %c0_2] : memref<128x128xf32, #tpu.memory_space<vmem>>, vector<128x128xf32>
    %c0_3 = arith.constant 0 : index
    %c0_4 = arith.constant 0 : index
    %2 = vector.load %arg3[%c0_3, %c0_4] : memref<1x128xf32, #tpu.memory_space<vmem>>, vector<1x128xf32>
    %cst = arith.constant dense<0.000000e+00> : vector<8x128xf32>
    %3 = tpu.matmul %0, %1, %cst {dimension_numbers = #tpu.dot_dimension_numbers<[1], [0], [0], [1], [0, 0, 1, 1], [], []>} : vector<8x128xf32>, vector<128x128xf32>, vector<8x128xf32> -> vector<8x128xf32>
    %4 = vector.broadcast %2 : vector<1x128xf32> to vector<8x128xf32>
    %5 = arith.addf %3, %4 : vector<8x128xf32>
    %6 = math.tanh %5 : vector<8x128xf32>
    %c0_5 = arith.constant 0 : index
    %c0_6 = arith.constant 0 : index
    %7 = vector.load %arg4[%c0_5, %c0_6] : memref<128x128xf32, #tpu.memory_space<vmem>>, vector<128x128xf32>
    %c0_7 = arith.constant 0 : index
    %c0_8 = arith.constant 0 : index
    %8 = vector.load %arg5[%c0_7, %c0_8] : memref<1x128xf32, #tpu.memory_space<vmem>>, vector<1x128xf32>
    %cst_9 = arith.constant dense<0.000000e+00> : vector<8x128xf32>
    %9 = tpu.matmul %6, %7, %cst_9 {dimension_numbers = #tpu.dot_dimension_numbers<[1], [0], [0], [1], [0, 0, 1, 1], [], []>} : vector<8x128xf32>, vector<128x128xf32>, vector<8x128xf32> -> vector<8x128xf32>
    %10 = vector.broadcast %8 : vector<1x128xf32> to vector<8x128xf32>
    %11 = arith.addf %9, %10 : vector<8x128xf32>
    %12 = math.tanh %11 : vector<8x128xf32>
    %c0_10 = arith.constant 0 : index
    %c0_11 = arith.constant 0 : index
    %13 = vector.load %arg6[%c0_10, %c0_11] : memref<128x128xf32, #tpu.memory_space<vmem>>, vector<128x128xf32>
    %c0_12 = arith.constant 0 : index
    %c0_13 = arith.constant 0 : index
    %14 = vector.load %arg7[%c0_12, %c0_13] : memref<1x128xf32, #tpu.memory_space<vmem>>, vector<1x128xf32>
    %cst_14 = arith.constant dense<0.000000e+00> : vector<8x128xf32>
    %15 = tpu.matmul %12, %13, %cst_14 {dimension_numbers = #tpu.dot_dimension_numbers<[1], [0], [0], [1], [0, 0, 1, 1], [], []>} : vector<8x128xf32>, vector<128x128xf32>, vector<8x128xf32> -> vector<8x128xf32>
    %16 = vector.broadcast %14 : vector<1x128xf32> to vector<8x128xf32>
    %17 = arith.addf %15, %16 : vector<8x128xf32>
    %cst_15 = arith.constant 0.000000e+00 : f32
    %18 = vector.broadcast %cst_15 : f32 to vector<8x128xf32>
    %19 = arith.maximumf %17, %18 : vector<8x128xf32>
    %c0_16 = arith.constant 0 : index
    %c0_17 = arith.constant 0 : index
    %20 = vector.load %arg8[%c0_16, %c0_17] : memref<8x128xf32, #tpu.memory_space<vmem>>, vector<8x128xf32>
    tpu.vector_store %arg8[%c0_16, %c0_17], %19 {strides = array<i32>} : memref<8x128xf32, #tpu.memory_space<vmem>>, vector<8x128xf32>,
    return
  }
  func.func @transform_0(%arg0: i32) -> (i32, i32) {
    %c0_i32 = arith.constant 0 : i32
    %c0_i32_0 = arith.constant 0 : i32
    return %arg0, %c0_i32 : i32, i32
  }
  func.func @transform_1(%arg0: i32) -> (i32, i32) {
    %c0_i32 = arith.constant 0 : i32
    %c0_i32_0 = arith.constant 0 : i32
    %c0_i32_1 = arith.constant 0 : i32
    return %c0_i32, %c0_i32_0 : i32, i32
  }
  func.func @transform_2(%arg0: i32) -> (i32, i32) {
    %c0_i32 = arith.constant 0 : i32
    %c0_i32_0 = arith.constant 0 : i32
    %c0_i32_1 = arith.constant 0 : i32
    return %c0_i32, %c0_i32_0 : i32, i32
  }
  func.func @transform_3(%arg0: i32) -> (i32, i32) {
    %c0_i32 = arith.constant 0 : i32
    %c0_i32_0 = arith.constant 0 : i32
    %c0_i32_1 = arith.constant 0 : i32
    return %c0_i32, %c0_i32_0 : i32, i32
  }
  func.func @transform_4(%arg0: i32) -> (i32, i32) {
    %c0_i32 = arith.constant 0 : i32
    %c0_i32_0 = arith.constant 0 : i32
    %c0_i32_1 = arith.constant 0 : i32
    return %c0_i32, %c0_i32_0 : i32, i32
  }
  func.func @transform_5(%arg0: i32) -> (i32, i32) {
    %c0_i32 = arith.constant 0 : i32
    %c0_i32_0 = arith.constant 0 : i32
    %c0_i32_1 = arith.constant 0 : i32
    return %c0_i32, %c0_i32_0 : i32, i32
  }
  func.func @transform_6(%arg0: i32) -> (i32, i32) {
    %c0_i32 = arith.constant 0 : i32
    %c0_i32_0 = arith.constant 0 : i32
    %c0_i32_1 = arith.constant 0 : i32
    return %c0_i32, %c0_i32_0 : i32, i32
  }
  func.func @transform_7(%arg0: i32) -> (i32, i32) {
    %c0_i32 = arith.constant 0 : i32
    %c0_i32_0 = arith.constant 0 : i32
    return %arg0, %c0_i32 : i32, i32
  }
}

</mosaic_0001>

<bundles_post_ra>
// kernel: tpu_custom_call.1
= control target key start
LH: loop header
LB: loop body
LE: loop exit
PB: predicated region body
PF: predicated region fallthrough
CT: control target
= control target key end

     0   :  { %12 = vsyncpa [#allocation3], 0  ;;  %s797_s0 = inlined_call_operand.hbm [shape: f32[8,128], index: 0, kind: input, shape index: {}]   ;;  %s798_s1 = inlined_call_operand.hbm [shape: f32[128,128], index: 1, kind: input, shape index: {}]   ;;  %s799_s2 = inlined_call_operand.vmem [shape: f32[1,128], index: 2, kind: input, shape index: {}]   ;;  %s800_s3 = inlined_call_operand.hbm [shape: f32[128,128], index: 3, kind: input, shape index: {}]   ;;  %s801_s4 = inlined_call_operand.vmem [shape: f32[1,128], index: 4, kind: input, shape index: {}]   ;;  %s802_s5 = inlined_call_operand.hbm [shape: f32[128,128], index: 5, kind: input, shape index: {}]   ;;  %s803_s6 = inlined_call_operand.vmem [shape: f32[1,128], index: 6, kind: input, shape index: {}]   ;;  %s804_s7 = inlined_call_operand.hbm [shape: f32[8,128], index: 7, kind: output, shape index: {}]  }
   0x1   :  { %13 = vsyncpa [#allocation6], 0 }
   0x2   :  { %14 = vsyncpa [#allocation9], 0 }
   0x3   :  { %15 = vsyncpa [#allocation4], 0  ;;  %s661_s24 = smov [#allocation5]  }
   0x4   :  { %s31_s25 = sshll.u32 %s661_s24, 4  ;;  %s32_s25 = int_to_ptr.vmem [resolvable:$true] %s31_s25 }
   0x5   :  { %s561_s26 = scalar_lea.vmem %s32_s25, 2048  ;;  %p566_p1 = scmp.lt.s32.totalorder %s32_s25, %s32_s25 }
   0x6   :  { %p562_p0 = scmp.ne.s32.totalorder %s32_s25, %s561_s26  ;;  %p567_p2 = scmp.lt.s32.totalorder %s561_s26, %s561_s26 }
   0x8   :  { %p568_p3 = por %p567_p2, %p566_p1 }
   0xa   :  { %p569_p4 = pnand %p568_p3, %p562_p0 }
   0xc   :  { %572 = shalt.err (!%p569_p4)
}
   0xd   :  { %s662_s27 = smov 128   ;;  %s663_s28 = smov 8  }
   0xe   :  { %37 = dma.hbm_to_vmem [thread:$0]  %s798_s1, 2048, %s32_s25, [#allocation6], %s662_s27, %s662_s27, %s663_s28  }
   0xf   :  { %s664_s8 = smov [#allocation2]   ;;  %s665_s10 = smov [#allocation7]  }
  0x10   :  { %s22_s9 = sshll.u32 %s664_s8, 4  ;;  %s45_s11 = sshll.u32 %s665_s10, 4  ;;  %s23_s9 = int_to_ptr.vmem [resolvable:$true] %s22_s9  ;;  %s46_s11 = int_to_ptr.vmem [resolvable:$true] %s45_s11 }
  0x11   :  { %s581_s12 = scalar_lea.vmem %s23_s9, 128  ;;  %p586_p6 = scmp.lt.s32.totalorder %s23_s9, %s23_s9 }
  0x12   :  { %p582_p5 = scmp.ne.s32.totalorder %s23_s9, %s581_s12  ;;  %p587_p7 = scmp.lt.s32.totalorder %s581_s12, %s581_s12 }
  0x14   :  { %p588_p8 = por %p587_p7, %p586_p6 }
  0x16   :  { %p589_p9 = pnand %p588_p8, %p582_p5 }
  0x18   :  { %592 = shalt.err (!%p589_p9)
}
  0x19   :  { %25 = dma.hbm_to_vmem [thread:$0]  %s797_s0, 128, %s23_s9, [#allocation3]  }
  0x1a   :  { %s601_s15 = scalar_lea.vmem %s46_s11, 2048  ;;  %p606_p11 = scmp.lt.s32.totalorder %s46_s11, %s46_s11 }
  0x1b   :  { %p602_p10 = scmp.ne.s32.totalorder %s46_s11, %s601_s15  ;;  %p607_p12 = scmp.lt.s32.totalorder %s601_s15, %s601_s15 }
  0x1d   :  { %p608_p13 = por %p607_p12, %p606_p11 }
  0x1f   :  { %p609_p0 = pnand %p608_p13, %p602_p10 }
  0x21   :  { %612 = shalt.err (!%p609_p0)
}
  0x22   :  { %51 = dma.hbm_to_vmem [thread:$0]  %s800_s3, 2048, %s46_s11, [#allocation6], %s662_s27, %s662_s27, %s663_s28  }
  0x23   :  { %s666_s17 = smov [#allocation8]  }
  0x24   :  { %s59_s18 = sshll.u32 %s666_s17, 4  ;;  %s60_s18 = int_to_ptr.vmem [resolvable:$true] %s59_s18 }
  0x25   :  { %s621_s19 = scalar_lea.vmem %s60_s18, 2048  ;;  %p626_p2 = scmp.lt.s32.totalorder %s60_s18, %s60_s18 }
  0x26   :  { %p622_p1 = scmp.ne.s32.totalorder %s60_s18, %s621_s19  ;;  %p627_p3 = scmp.lt.s32.totalorder %s621_s19, %s621_s19 }
  0x28   :  { %p628_p4 = por %p627_p3, %p626_p2 }
  0x2a   :  { %p629_p5 = pnand %p628_p4, %p622_p1 }
  0x2c   :  { %632 = shalt.err (!%p629_p5)
}
  0x2d   :  { %65 = dma.hbm_to_vmem [thread:$0]  %s802_s5, 2048, %s60_s18, [#allocation9], %s662_s27, %s662_s27, %s663_s28  }
  0x2e   :  { %653 = dma.done.wait [#allocation3], 128  }
  0x2f   :  { %654 = vsyncadd [#allocation3], 4294967168 }
  0x30   :  { %655 = dma.done.wait [#allocation6], 4096  }
  0x31   :  { %656 = vsyncadd [#allocation6], 4294963200 }
  0x32   :  { %657 = dma.done.wait [#allocation9], 2048  }
  0x33   :  { %658 = vsyncadd [#allocation9], 4294965248  ;;  %v667_v0 = vmov 0.0   ;;  %vm668_vm0 = vmmov 0   ;;  %v96_v1 = vld [vmem:[#allocation5 + $0x78] sm:$0xff]  ;;  %v95_v2 = vld [vmem:[#allocation5 + $0x70] sm:$0xff] }
  0x34   :  { %435 = vmatprep.subr.mxu0 %v667_v0  ;;  %467 = vmatprep.mubr.msk.f32.mxu0 %vm668_vm0, %v667_v0  ;;  %v94_v3 = vld [vmem:[#allocation5 + $0x68] sm:$0xff]  ;;  %v93_v4 = vld [vmem:[#allocation5 + $0x60] sm:$0xff]  ;;  %v190_v5 = vld [vmem:[#allocation7 + $0x78] sm:$0xff]  ;;  %s669_s24 = smov [#allocation10]  }
  0x35   :  { %470 = vmatprep.subr.mxu1 %v667_v0  ;;  %502 = vmatprep.mubr.msk.f32.mxu1 %vm668_vm0, %v667_v0  ;;  %v92_v6 = vld [vmem:[#allocation5 + $0x58] sm:$0xff]  ;;  %v189_v7 = vld [vmem:[#allocation7 + $0x70] sm:$0xff]  ;;  %v188_v8 = vld [vmem:[#allocation7 + $0x68] sm:$0xff]  ;;  %s370_s25 = sshll.u32 %s669_s24, 4  ;;  %s371_s25 = int_to_ptr.vmem [resolvable:$true] %s370_s25 }
  0x36   :  { %436 = vmatpush3.msra.mxu0 %v96_v1  ;;  %471 = vmatpush3.msra.mxu1 %v190_v5  ;;  %v91_v9 = vld [vmem:[#allocation5 + $0x50] sm:$0xff]  ;;  %v187_v10 = vld [vmem:[#allocation7 + $0x60] sm:$0xff]  ;;  %v90_v11 = vld [vmem:[#allocation5 + $0x48] sm:$0xff]  ;;  %s633_s26 = scalar_lea.vmem %s371_s25, 128  ;;  %p638_p7 = scmp.lt.s32.totalorder %s371_s25, %s371_s25 }
  0x37   :  { %437 = vmatprep.subr.mxu0 %v667_v0  ;;  %472 = vmatprep.subr.mxu1 %v667_v0  ;;  %v186_v12 = vld [vmem:[#allocation7 + $0x58] sm:$0xff]  ;;  %v89_v13 = vld [vmem:[#allocation5 + $0x40] sm:$0xff]  ;;  %v185_v14 = vld [vmem:[#allocation7 + $0x50] sm:$0xff]  ;;  %p634_p6 = scmp.ne.s32.totalorder %s371_s25, %s633_s26  ;;  %p639_p8 = scmp.lt.s32.totalorder %s633_s26, %s633_s26 }
  0x38   :  { %438 = vmatpush3.msra.mxu0 %v95_v2  ;;  %473 = vmatpush3.msra.mxu1 %v189_v7  ;;  %v88_v15 = vld [vmem:[#allocation5 + $0x38] sm:$0xff]  ;;  %v184_v16 = vld [vmem:[#allocation7 + $0x48] sm:$0xff]  ;;  %v87_v17 = vld [vmem:[#allocation5 + $0x30] sm:$0xff] }
  0x39   :  { %439 = vmatprep.subr.mxu0 %v667_v0  ;;  %474 = vmatprep.subr.mxu1 %v667_v0  ;;  %v86_v18 = vld [vmem:[#allocation5 + $0x28] sm:$0xff]  ;;  %v85_v19 = vld [vmem:[#allocation5 + $0x20] sm:$0xff]  ;;  %v84_v20 = vld [vmem:[#allocation5 + $0x18] sm:$0xff]  ;;  %p640_p9 = por %p639_p8, %p638_p7 }
  0x3a   :  { %440 = vmatpush3.msra.mxu0 %v94_v3  ;;  %475 = vmatpush3.msra.mxu1 %v188_v8  ;;  %v83_v21 = vld [vmem:[#allocation5 + $0x10] sm:$0xff]  ;;  %v82_v22 = vld [vmem:[#allocation5 + $0x8] sm:$0xff]  ;;  %v81_v23 = vld [vmem:[#allocation5] sm:$0xff] }
  0x3b   :  { %441 = vmatprep.subr.mxu0 %v667_v0  ;;  %476 = vmatprep.subr.mxu1 %v667_v0  ;;  %v80_v24 = vld [vmem:[#allocation2] sm:$0xff]  ;;  %v183_v25 = vld [vmem:[#allocation7 + $0x40] sm:$0xff]  ;;  %v181_v27 = vld [vmem:[#allocation7 + $0x30] sm:$0xff]  ;;  %p641_p10 = pnand %p640_p9, %p634_p6 }
  0x3c   :  { %442 = vmatpush3.msra.mxu0 %v93_v4  ;;  %477 = vmatpush3.msra.mxu1 %v187_v10  ;;  %v182_v26 = vld [vmem:[#allocation7 + $0x38] sm:$0xff]  ;;  %v180_v28 = vld [vmem:[#allocation7 + $0x28] sm:$0xff]  ;;  %v179_v29 = vld [vmem:[#allocation7 + $0x20] sm:$0xff] }
  0x3d   :  { %443 = vmatprep.subr.mxu0 %v667_v0  ;;  %478 = vmatprep.subr.mxu1 %v667_v0  ;;  %v178_v30 = vld [vmem:[#allocation7 + $0x18] sm:$0xff]  ;;  %v177_v31 = vld [vmem:[#allocation7 + $0x10] sm:$0xff]  ;;  %v176_v32 = vld [vmem:[#allocation7 + $0x8] sm:$0xff] }
  0x3e   :  { %444 = vmatpush3.msra.mxu0 %v92_v6  ;;  %479 = vmatpush3.msra.mxu1 %v186_v12  ;;  %v175_v33 = vld [vmem:[#allocation7] sm:$0xff]  ;;  %v284_v34 = vld [vmem:[#allocation8 + $0x78] sm:$0xff]  ;;  %v283_v35 = vld [vmem:[#allocation8 + $0x70] sm:$0xff] }
  0x3f   :  { %445 = vmatprep.subr.mxu0 %v667_v0  ;;  %480 = vmatprep.subr.mxu1 %v667_v0  ;;  %v282_v36 = vld [vmem:[#allocation8 + $0x68] sm:$0xff]  ;;  %v281_v37 = vld [vmem:[#allocation8 + $0x60] sm:$0xff]  ;;  %v280_v38 = vld [vmem:[#allocation8 + $0x58] sm:$0xff] }
  0x40   :  { %446 = vmatpush3.msra.mxu0 %v91_v9  ;;  %481 = vmatpush3.msra.mxu1 %v185_v14  ;;  %v279_v39 = vld [vmem:[#allocation8 + $0x50] sm:$0xff]  ;;  %v278_v40 = vld [vmem:[#allocation8 + $0x48] sm:$0xff]  ;;  %v381_v41 = vld [vmem:[%s799_s2] ss:$0 sm:$0xff] }
  0x41   :  { %447 = vmatprep.subr.mxu0 %v667_v0  ;;  %482 = vmatprep.subr.mxu1 %v667_v0  ;;  %v277_v46 = vld [vmem:[#allocation8 + $0x40] sm:$0xff]  ;;  %v276_v47 = vld [vmem:[#allocation8 + $0x38] sm:$0xff]  ;;  %v275_v48 = vld [vmem:[#allocation8 + $0x30] sm:$0xff] }
  0x42   :  { %448 = vmatpush3.msra.mxu0 %v90_v11  ;;  %483 = vmatpush3.msra.mxu1 %v184_v16  ;;  %v274_v49 = vld [vmem:[#allocation8 + $0x28] sm:$0xff]  ;;  %v273_v50 = vld [vmem:[#allocation8 + $0x20] sm:$0xff]  ;;  %v272_v51 = vld [vmem:[#allocation8 + $0x18] sm:$0xff] }
  0x43   :  { %449 = vmatprep.subr.mxu0 %v667_v0  ;;  %484 = vmatprep.subr.mxu1 %v667_v0  ;;  %v271_v52 = vld [vmem:[#allocation8 + $0x10] sm:$0xff]  ;;  %v270_v53 = vld [vmem:[#allocation8 + $0x8] sm:$0xff]  ;;  %v269_v54 = vld [vmem:[#allocation8] sm:$0xff] }
  0x44   :  { %450 = vmatpush3.msra.mxu0 %v89_v13  ;;  %485 = vmatpush3.msra.mxu1 %v183_v25  ;;  %v382_v55 = vld [vmem:[%s801_s4] ss:$0 sm:$0xff] }
  0x45   :  { %451 = vmatprep.subr.mxu0 %v667_v0  ;;  %486 = vmatprep.subr.mxu1 %v667_v0  ;;  %v383_v60 = vld [vmem:[%s803_s6] ss:$0 sm:$0xff] }
  0x46   :  { %452 = vmatpush3.msra.mxu0 %v88_v15  ;;  %487 = vmatpush3.msra.mxu1 %v182_v26 }
  0x47   :  { %453 = vmatprep.subr.mxu0 %v667_v0  ;;  %488 = vmatprep.subr.mxu1 %v667_v0 }
  0x48   :  { %454 = vmatpush3.msra.mxu0 %v87_v17  ;;  %489 = vmatpush3.msra.mxu1 %v181_v27 }
  0x49   :  { %455 = vmatprep.subr.mxu0 %v667_v0  ;;  %490 = vmatprep.subr.mxu1 %v667_v0 }
  0x4a   :  { %456 = vmatpush3.msra.mxu0 %v86_v18  ;;  %491 = vmatpush3.msra.mxu1 %v180_v28 }
  0x4b   :  { %457 = vmatprep.subr.mxu0 %v667_v0  ;;  %492 = vmatprep.subr.mxu1 %v667_v0 }
  0x4c   :  { %458 = vmatpush3.msra.mxu0 %v85_v19  ;;  %493 = vmatpush3.msra.mxu1 %v179_v29 }
  0x4d   :  { %459 = vmatprep.subr.mxu0 %v667_v0  ;;  %494 = vmatprep.subr.mxu1 %v667_v0 }
  0x4e   :  { %460 = vmatpush3.msra.mxu0 %v84_v20  ;;  %495 = vmatpush3.msra.mxu1 %v178_v30 }
  0x4f   :  { %461 = vmatprep.subr.mxu0 %v667_v0  ;;  %496 = vmatprep.subr.mxu1 %v667_v0 }
  0x50   :  { %462 = vmatpush3.msra.mxu0 %v83_v21  ;;  %497 = vmatpush3.msra.mxu1 %v177_v31 }
  0x51   :  { %463 = vmatprep.subr.mxu0 %v667_v0  ;;  %498 = vmatprep.subr.mxu1 %v667_v0 }
  0x52   :  { %464 = vmatpush3.msra.mxu0 %v82_v22  ;;  %499 = vmatpush3.msra.mxu1 %v176_v32 }
  0x53   :  { %465 = vmatprep.subr.mxu0 %v667_v0  ;;  %500 = vmatprep.subr.mxu1 %v667_v0 }
  0x54   :  { %466 = vmatpush3.msra.mxu0 %v81_v23  ;;  %501 = vmatpush3.msra.mxu1 %v175_v33 }
  0x55   :  { %468 = vmatmul.mubr.f32.vlgmr.msra.gmra.mxu0 %v80_v24  ;;  %505 = vmatprep.subr.mxu0 %v667_v0 }
  0x56   :  { %537 = vmatprep.mubr.msk.f32.mxu0 %vm668_vm0, %v667_v0  ;;  %506 = vmatpush3.msra.mxu0 %v284_v34 }
  0x57   :  { %507 = vmatprep.subr.mxu0 %v667_v0 }
  0x58   :  { %508 = vmatpush3.msra.mxu0 %v283_v35 }
  0x59   :  { %509 = vmatprep.subr.mxu0 %v667_v0 }
  0x5a   :  { %510 = vmatpush3.msra.mxu0 %v282_v36 }
  0x5b   :  { %511 = vmatprep.subr.mxu0 %v667_v0 }
  0x5c   :  { %512 = vmatpush3.msra.mxu0 %v281_v37 }
  0x5d   :  { %513 = vmatprep.subr.mxu0 %v667_v0 }
  0x5e   :  { %514 = vmatpush3.msra.mxu0 %v280_v38 }
  0x5f   :  { %515 = vmatprep.subr.mxu0 %v667_v0 }
  0x60   :  { %516 = vmatpush3.msra.mxu0 %v279_v39 }
  0x61   :  { %517 = vmatprep.subr.mxu0 %v667_v0 }
  0x62   :  { %518 = vmatpush3.msra.mxu0 %v278_v40 }
  0x63   :  { %519 = vmatprep.subr.mxu0 %v667_v0 }
  0x64   :  { %520 = vmatpush3.msra.mxu0 %v277_v46 }
  0x65   :  { %521 = vmatprep.subr.mxu0 %v667_v0 }
  0x66   :  { %522 = vmatpush3.msra.mxu0 %v276_v47 }
  0x67   :  { %523 = vmatprep.subr.mxu0 %v667_v0 }
  0x68   :  { %524 = vmatpush3.msra.mxu0 %v275_v48 }
  0x69   :  { %525 = vmatprep.subr.mxu0 %v667_v0 }
  0x6a   :  { %526 = vmatpush3.msra.mxu0 %v274_v49 }
  0x6b   :  { %527 = vmatprep.subr.mxu0 %v667_v0 }
  0x6c   :  { %528 = vmatpush3.msra.mxu0 %v273_v50 }
  0x6d   :  { %529 = vmatprep.subr.mxu0 %v667_v0 }
  0x6e   :  { %530 = vmatpush3.msra.mxu0 %v272_v51 }
  0x6f   :  { %531 = vmatprep.subr.mxu0 %v667_v0 }
  0x70   :  { %532 = vmatpush3.msra.mxu0 %v271_v52 }
  0x71   :  { %533 = vmatprep.subr.mxu0 %v667_v0 }
  0x72   :  { %534 = vmatpush3.msra.mxu0 %v270_v53 }
  0x73   :  { %535 = vmatprep.subr.mxu0 %v667_v0 }
  0x74   :  { %536 = vmatpush3.msra.mxu0 %v269_v54 }
 0x115   :  { %v170_v42 = vpop.f32.mrf.mxu0 }
 0x116   :  { %v171_v43 = vadd.f32 %v381_v41, %v170_v42 }
 0x117   :  { %v469_v44 = vpop.f32.mrf.mxu0 }
 0x118   :  { %549 = vtanh.f32 %v171_v43 }
 0x125   :  { %v550_v45 = vpop.eup %549 }
 0x126   :  { %503 = vmatmul.mubr.f32.vlgmr.msra.gmra.mxu1 %v550_v45 }
 0x1e6   :  { %v264_v56 = vpop.f32.mrf.mxu1 }
 0x1e7   :  { %v265_v57 = vadd.f32 %v382_v55, %v264_v56 }
 0x1e8   :  { %v504_v58 = vpop.f32.mrf.mxu1 }
 0x1e9   :  { %551 = vtanh.f32 %v265_v57 }
 0x1f6   :  { %v552_v59 = vpop.eup %551 }
 0x1f7   :  { %538 = vmatmul.mubr.f32.vlgmr.msra.gmra.mxu0 %v552_v59 }
 0x2b7   :  { %v358_v61 = vpop.f32.mrf.mxu0 }
 0x2b8   :  { %v359_v62 = vadd.f32 %v383_v60, %v358_v61 }
 0x2b9   :  { %v539_v63 = vpop.f32.mrf.mxu0 }
 0x2ba   :  { %v362_v0 = vmax.f32 %v359_v62, 0.0 }
 0x2bc   :  { %363 = vst [vmem:[#allocation10] sm:$0xff] %v362_v0 }
 0x2bd   :  { %644 = shalt.err (!%p641_p10)
}
 0x2be   :  { %373 = dma.vmem_to_hbm [thread:$0]  %s371_s25, 128, %s804_s7, [#allocation4]  }
 0x2bf   :  { %659 = dma.done.wait [#allocation4], 128  }
 0x2c0   :  { %660 = vsyncadd [#allocation4], 4294967168 }
 0x2c1   :  { %377 = vsyncpa [#allocation3], 1 }
 0x2c2   :  { %378 = vsyncpa [#allocation6], 1 }
 0x2c3   :  { %379 = vsyncpa [#allocation9], 1 }
 0x2c4   :  { %380 = vsyncpa [#allocation4], 1 }

</bundles_post_ra>
